<compile_context>
chip_gen: v5e
topology: v5e:2x2
jax: 0.10.0
libtpu: 0.0.40
codegen_flags: <defaults>
</compile_context>

<pallas_src>
import math
import functools

import jax
import jax.numpy as jnp
import numpy as np
from jax import lax
from jax.experimental import pallas as pl
from jax.experimental.pallas import tpu as pltpu


# -----------------------------------------------------------------------------
# Kernel 1: fused QKV projection + RoPE.   grid = (B, T // bt)
# -----------------------------------------------------------------------------
def qkv_rope_kernel(x_ref, w_ref, b_ref, rope_a_ref, rope_b_ref,
                    q_ref, k_ref, v_ref, *, num_heads, head_dim, embed_dim):
    x = x_ref[...]                                                  # (bt, D) bf16
    # Single MXU stream: (bt, D) @ (D, 3D) -> (bt, 3D), f32 accumulation.
    qkv = jnp.dot(x, w_ref[...], preferred_element_type=jnp.float32) + b_ref[...]
    D = embed_dim
    q = qkv[:, 0 * D:1 * D]
    k = qkv[:, 1 * D:2 * D]
    v = qkv[:, 2 * D:3 * D]

    # RoPE with hoisted, full-width (bt, D) tables.  q/k within-head dims were
    # de-interleaved to [even-half | odd-half] via the weight columns, so the
    # torch pairwise rotate becomes a per-head half-swap of an in-register
    # value (static lane slices + concat), two full-width VPU FMAs, and a
    # single lane-dense store per tensor.
    a = rope_a_ref[...]                 # per head: [cos | sin]
    b = rope_b_ref[...]                 # per head: [-(1-cos) | (1-sin)]
    half = head_dim // 2

    def half_swap(t):                   # per-head [lo | hi] -> [hi | lo]
        parts = []
        for h in range(num_heads):
            lo = h * head_dim
            parts.append(t[:, lo + half:lo + head_dim])
            parts.append(t[:, lo:lo + half])
        return jnp.concatenate(parts, axis=1)

    q_ref[...] = (q * a + half_swap(q) * b).astype(q_ref.dtype)
    k_ref[...] = (k * a + half_swap(k) * b).astype(k_ref.dtype)
    v_ref[...] = v.astype(v_ref.dtype)


# -----------------------------------------------------------------------------
# Kernel 2: flash-style causal attention + fused output projection.
# grid = (B, n_q_tiles, n_kv_tiles)   (kv axis last, "arbitrary")
# -----------------------------------------------------------------------------
def flash_attn_proj_kernel(q_ref, k_ref, v_ref, wp_ref, bp_ref, o_ref,
                           m_scr, l_scr, acc_scr, *,
                           num_heads, head_dim, block_q, block_k, scale):
    qi = pl.program_id(1)
    ki = pl.program_id(2)

    @pl.when(ki == 0)
    def _init():
        m_scr[...] = jnp.full_like(m_scr, -jnp.inf)
        l_scr[...] = jnp.zeros_like(l_scr)
        acc_scr[...] = jnp.zeros_like(acc_scr)

    # NOTE: _accumulate must stay traced before _finalize -- the finalize
    # consumes the diagonal (ki == qi) block's contribution.
    @pl.when(ki <= qi)                 # skip fully-masked upper-triangle blocks
    def _accumulate():
        q = q_ref[...]                 # (bq, D) bf16, RoPE already applied
        k = k_ref[...]                 # (bk, D) bf16
        v = v_ref[...]                 # (bk, D) bf16

        row = qi * block_q + lax.broadcasted_iota(jnp.int32, (block_q, block_k), 0)
        col = ki * block_k + lax.broadcasted_iota(jnp.int32, (block_q, block_k), 1)
        causal = col <= row

        m_prev = m_scr[...]            # (bq, H) f32
        l_prev = l_scr[...]

        alpha_parts, pv_parts, m_cols, l_cols = [], [], [], []
        # TODO(synk): for large num_heads switch to lax.fori_loop to bound the
        # vreg live ranges of the per-head (bq, bk) score / probability tiles.
        for h in range(num_heads):
            sl = slice(h * head_dim, (h + 1) * head_dim)
            s = lax.dot_general(q[:, sl], k[:, sl], (((1,), (1,)), ((), ())),
                                preferred_element_type=jnp.float32) * scale
            s = jnp.where(causal, s, -jnp.inf)

            m_p = m_prev[:, h:h + 1]                                    # (bq, 1)
            m_n = jnp.maximum(m_p, jnp.max(s, axis=-1, keepdims=True))
            alpha = jnp.exp(m_p - m_n)
            p = jnp.exp(s - m_n)                                        # f32
            l_cols.append(alpha * l_prev[:, h:h + 1]
                          + jnp.sum(p, axis=-1, keepdims=True))
            m_cols.append(m_n)
            alpha_parts.append(jnp.broadcast_to(alpha, (block_q, head_dim)))
            pv_parts.append(lax.dot_general(p.astype(v.dtype), v[:, sl],
                                            (((1,), (0,)), ((), ())),
                                            preferred_element_type=jnp.float32))

        # Full-width accumulator update: one unmasked (bq, D) load + store per
        # kv step instead of 2*H masked sub-lane read-modify-writes.
        alpha_full = jnp.concatenate(alpha_parts, axis=1)               # (bq, D)
        pv_full = jnp.concatenate(pv_parts, axis=1)                     # (bq, D)
        acc_scr[...] = alpha_full * acc_scr[...] + pv_full
        m_scr[...] = jnp.concatenate(m_cols, axis=1)                    # (bq, H)
        l_scr[...] = jnp.concatenate(l_cols, axis=1)                    # (bq, H)

    @pl.when(ki == qi)                 # last contributing kv block -> finalize
    def _finalize():
        inv_l = pl.reciprocal(l_scr[...], approx=True)                  # (bq, H)
        inv_full = jnp.concatenate(
            [jnp.broadcast_to(inv_l[:, h:h + 1], (block_q, head_dim))
             for h in range(num_heads)], axis=1)                        # (bq, D)
        y = (acc_scr[...] * inv_full).astype(jnp.bfloat16)
        # Fused output projection: avoids the HBM write + re-read of y.
        out = jnp.dot(y, wp_ref[...],
                      preferred_element_type=jnp.float32) + bp_ref[...]
        o_ref[...] = out.astype(o_ref.dtype)                            # lane-dense


# -----------------------------------------------------------------------------
# module wrapper
# -----------------------------------------------------------------------------
def _deinterleave_last(w):
    # [..., d0, d1, d2, ...] -> [..., evens | odds]
    return jnp.concatenate([w[..., 0::2], w[..., 1::2]], axis=-1)


def _pick_tile(total, cap):
    # Largest tile <= cap dividing `total` that is a multiple of 8 (sublane)
    # or equal to the full extent.
    for cand in range(min(total, cap), 0, -1):
        if total % cand == 0 and (cand % 8 == 0 or cand == total):
            return cand
    return total


def causal_self_attention(x, params, num_heads):
    B, T, D = x.shape
    H = num_heads
    hd = D // H
    assert hd * H == D, "embed_dim must be divisible by num_heads"
    assert hd % 2 == 0, "head_dim must be even for RoPE"
    inter_dtype = jnp.bfloat16      # q/k/v intermediates in HBM (halves traffic)

    # ---- one-time, weight-sized parameter re-layout (plain XLA) --------------
    w3 = params["w_qkv"].reshape(D, H, 3, hd)
    b3 = params["b_qkv"].reshape(H, 3, hd)
    wq = _deinterleave_last(w3[:, :, 0, :]).reshape(D, D)
    wk = _deinterleave_last(w3[:, :, 1, :]).reshape(D, D)
    wv = w3[:, :, 2, :].reshape(D, D)
    w_qkv = jnp.concatenate([wq, wk, wv], axis=1).astype(jnp.bfloat16)   # (D, 3D)
    bq = _deinterleave_last(b3[:, 0, :]).reshape(1, D)
    bk = _deinterleave_last(b3[:, 1, :]).reshape(1, D)
    bv = b3[:, 2, :].reshape(1, D)
    b_qkv = jnp.concatenate([bq, bk, bv], axis=1).astype(jnp.float32)    # (1, 3D)
    w_proj = params["w_proj"].astype(jnp.bfloat16)
    b_proj = params["b_proj"].reshape(1, D).astype(jnp.float32)

    # ---- hoisted full-width RoPE tables (per head: [even half | odd half]) ---
    pos = jnp.arange(T, dtype=jnp.float32)[:, None]
    inv_freq = 1.0 / (10000.0 ** (jnp.arange(0, hd, 2, dtype=jnp.float32) / hd))
    ang = pos * inv_freq[None, :]                                        # (T, hd/2)
    cos_t, sin_t = jnp.cos(ang), jnp.sin(ang)
    rope_a = jnp.tile(jnp.concatenate([cos_t, sin_t], axis=1), (1, H))   # (T, D)
    rope_b = jnp.tile(jnp.concatenate([-(1.0 - cos_t), 1.0 - sin_t], axis=1),
                      (1, H))                                            # (T, D)

    x_bf = x.astype(jnp.bfloat16)       # cast once here, not per-tile in-kernel

    # ---- generation-aware tiling ----------------------------------------------
    try:
        kind = jax.devices()[0].device_kind.lower()
    except Exception:
        kind = ""
    newer_gen = ("v6" in kind) or ("v7" in kind)
    bt = _pick_tile(T, 512)                          # qkv+rope row tile
    bs = _pick_tile(T, 256 if newer_gen else 128)    # attention q / kv tile
    nq = T // bs

    # ---- explicit VMEM budgets (double-buffered pipeline blocks + scratch) ---
    x_bytes = jnp.dtype(x.dtype).itemsize
    k1_bytes = 2 * (bt * D * 2 + D * 3 * D * 2 + 3 * D * 4
                    + 2 * bt * D * 4 + 3 * bt * D * 2)
    k2_bytes = (2 * (3 * bs * D * 2 + D * D * 2 + D * 4 + bs * D * x_bytes)
                + bs * (2 * H + D) * 4)
    vmem1 = int(min(max(2 * k1_bytes, 16 * 2**20), 64 * 2**20))
    vmem2 = int(min(max(2 * k2_bytes, 16 * 2**20), 64 * 2**20))
    # TODO(synk): for very large D additionally tile the resident weights over
    # D_out (or mark their constant-index BlockSpecs pl.Buffered(1)) to stay
    # within v7x's 64 MiB VMEM.
    # TODO(synk): for head_dim < 128 the heads-on-lane layout underfills the
    # MXU contraction; fold B*H into the batch grid (hd padded to 128) there.
    # TODO(synk): attn_dropout / resid_dropout are identity (p=0.0, inference)
    # and are skipped.

    # ---- kernel 1: fused qkv projection + RoPE --------------------------------
    q, k, v = pl.pallas_call(
        functools.partial(qkv_rope_kernel, num_heads=H, head_dim=hd, embed_dim=D),
        grid=(B, T // bt),
        in_specs=[
            pl.BlockSpec((None, bt, D), lambda b, t: (b, t, 0)),     # x
            pl.BlockSpec((D, 3 * D), lambda b, t: (0, 0)),           # w_qkv (resident)
            pl.BlockSpec((1, 3 * D), lambda b, t: (0, 0)),           # b_qkv
            pl.BlockSpec((bt, D), lambda b, t: (t, 0)),              # rope_a
            pl.BlockSpec((bt, D), lambda b, t: (t, 0)),              # rope_b
        ],
        out_specs=[pl.BlockSpec((None, bt, D), lambda b, t: (b, t, 0))] * 3,
        out_shape=[jax.ShapeDtypeStruct((B, T, D), inter_dtype)] * 3,
        compiler_params=pltpu.CompilerParams(
            dimension_semantics=("parallel", "parallel"),
            vmem_limit_bytes=vmem1),
    )(x_bf, w_qkv, b_qkv, rope_a, rope_b)

    # ---- kernel 2: flash causal attention + fused output projection ----------
    # TODO(synk): the ki > qi grid steps are skipped (no compute, DMA clamped to
    # block qi) but still pay ~0.35us/step; for very long T move the kv loop
    # in-kernel (emit_pipeline / manual double-buffered DMA) to remove them.
    out = pl.pallas_call(
        functools.partial(flash_attn_proj_kernel, num_heads=H, head_dim=hd,
                          block_q=bs, block_k=bs, scale=1.0 / math.sqrt(hd)),
        grid=(B, nq, nq),
        in_specs=[
            pl.BlockSpec((None, bs, D), lambda b, qi, ki: (b, qi, 0)),
            pl.BlockSpec((None, bs, D),
                         lambda b, qi, ki: (b, jnp.minimum(ki, qi), 0)),
            pl.BlockSpec((None, bs, D),
                         lambda b, qi, ki: (b, jnp.minimum(ki, qi), 0)),
            pl.BlockSpec((D, D), lambda b, qi, ki: (0, 0)),          # w_proj (resident)
            pl.BlockSpec((1, D), lambda b, qi, ki: (0, 0)),          # b_proj
        ],
        out_specs=pl.BlockSpec((None, bs, D), lambda b, qi, ki: (b, qi, 0)),
        out_shape=jax.ShapeDtypeStruct((B, T, D), x.dtype),
        scratch_shapes=[
            pltpu.VMEM((bs, H), jnp.float32),   # running max per head
            pltpu.VMEM((bs, H), jnp.float32),   # running denom per head
            pltpu.VMEM((bs, D), jnp.float32),   # full-width output accumulator
        ],
        compiler_params=pltpu.CompilerParams(
            dimension_semantics=("parallel", "parallel", "arbitrary"),
            vmem_limit_bytes=vmem2),
    )(q, k, v, w_proj, b_proj)
    return out


# -----------------------------------------------------------------------------
# pure-JAX reference (mirrors the torch module exactly, in f32)
# -----------------------------------------------------------------------------
def reference(x, params, num_heads):
    B, T, D = x.shape
    hd = D // num_heads
    qkv = x @ params["w_qkv"] + params["b_qkv"]
    qkv = qkv.reshape(B, T, num_heads, 3 * hd).transpose(0, 2, 1, 3)
    q, k, v = qkv[..., :hd], qkv[..., hd:2 * hd], qkv[..., 2 * hd:]

    pos = jnp.arange(T, dtype=jnp.float32)
    angles = pos[:, None] / 10000.0 ** (jnp.arange(0, hd, 2, dtype=jnp.float32) / hd)
    rope = jnp.zeros((T, hd), jnp.float32)
    rope = rope.at[:, 0::2].set(jnp.cos(angles)).at[:, 1::2].set(jnp.sin(angles))

    def rotate(t):
        r = jnp.zeros_like(t)
        r = r.at[..., 0::2].set(-t[..., 1::2])
        r = r.at[..., 1::2].set(t[..., 0::2])
        return r

    q = q * rope + rotate(q) * (1.0 - rope)
    k = k * rope + rotate(k) * (1.0 - rope)

    att = (q @ jnp.swapaxes(k, -1, -2)) / math.sqrt(hd)
    mask = jnp.tril(jnp.ones((T, T)))
    att = jnp.where(mask == 0, -jnp.inf, att)
    att = jax.nn.softmax(att, axis=-1)
    y = att @ v
    y = y.transpose(0, 2, 1, 3).reshape(B, T, D)
    return y @ params["w_proj"] + params["b_proj"]


# -----------------------------------------------------------------------------
# main
# -----------------------------------------------------------------------------
if __name__ == "__main__":
    def make_case(B, T, D, H, seed):
        key = jax.random.PRNGKey(seed)
        k_x, k_wq, k_bq, k_wp, k_bp = jax.random.split(key, 5)
        x = jax.random.normal(k_x, (B, T, D), dtype=jnp.float32)
        params = {
            # stored already transposed for x @ W (torch Linear weight is (out, in))
            "w_qkv": 0.02 * jax.random.normal(k_wq, (D, 3 * D), dtype=jnp.float32),
            "b_qkv": 0.02 * jax.random.normal(k_bq, (3 * D,), dtype=jnp.float32),
            "w_proj": 0.02 * jax.random.normal(k_wp, (D, D), dtype=jnp.float32),
            "b_proj": 0.02 * jax.random.normal(k_bp, (D,), dtype=jnp.float32),
        }
        return x, params

    # Small shapes consistent with the module: batch=2, seq=8, embed=32, heads=4.
    x, params = make_case(2, 8, 32, 4, 0)
    out = jax.block_until_ready(causal_self_attention(x, params, 4))
    ref = reference(x, params, 4)
    np.testing.assert_allclose(np.asarray(out), np.asarray(ref), atol=2e-2, rtol=2e-2)

    # A modest larger case (head_dim=128, multiple q/kv tiles) to exercise the
    # tiling, causal-skip and pipelining paths flagged by the review.
    x2, params2 = make_case(2, 512, 256, 2, 1)
    out2 = jax.block_until_ready(causal_self_attention(x2, params2, 2))
    ref2 = reference(x2, params2, 2)
    np.testing.assert_allclose(np.asarray(out2), np.asarray(ref2), atol=2e-2, rtol=2e-2)

    print("KERNEL_OK")
</pallas_src>

<mosaic_0001>
module attributes {stable_mosaic.version = 11 : i64} {
  func.func @qkv_rope_kernel(%arg0: i32, %arg1: i32, %arg2: memref<1x8x32xbf16, #tpu.memory_space<vmem>>, %arg3: memref<32x96xbf16, #tpu.memory_space<vmem>>, %arg4: memref<1x96xf32, #tpu.memory_space<vmem>>, %arg5: memref<8x32xf32, #tpu.memory_space<vmem>>, %arg6: memref<8x32xf32, #tpu.memory_space<vmem>>, %arg7: memref<1x8x32xbf16, #tpu.memory_space<vmem>>, %arg8: memref<1x8x32xbf16, #tpu.memory_space<vmem>>, %arg9: memref<1x8x32xbf16, #tpu.memory_space<vmem>>) attributes {dimension_semantics = [#tpu.dimension_semantics<parallel>, #tpu.dimension_semantics<parallel>], iteration_bounds = array<i64: 2, 1>, scalar_prefetch = 0 : i64, scratch_operands = 0 : i64, tpu.core_type = #tpu.core_type<tc>, window_params = [{transform_indices = @transform_0, window_bounds = array<i64: 1, 8, 32>}, {pipeline_mode = #tpu.pipeline_mode<synchronous>, transform_indices = @transform_1, window_bounds = array<i64: 32, 96>}, {pipeline_mode = #tpu.pipeline_mode<synchronous>, transform_indices = @transform_2, window_bounds = array<i64: 1, 96>}, {transform_indices = @transform_3, window_bounds = array<i64: 8, 32>}, {transform_indices = @transform_4, window_bounds = array<i64: 8, 32>}, {transform_indices = @transform_5, window_bounds = array<i64: 1, 8, 32>}, {transform_indices = @transform_6, window_bounds = array<i64: 1, 8, 32>}, {transform_indices = @transform_7, window_bounds = array<i64: 1, 8, 32>}]} {
    %c0 = arith.constant 0 : index
    %c0_0 = arith.constant 0 : index
    %c0_1 = arith.constant 0 : index
    %0 = vector.load %arg2[%c0, %c0_0, %c0_1] : memref<1x8x32xbf16, #tpu.memory_space<vmem>>, vector<1x8x32xbf16>
    %1 = vector.shape_cast %0 : vector<1x8x32xbf16> to vector<8x32xbf16>
    %c0_2 = arith.constant 0 : index
    %c0_3 = arith.constant 0 : index
    %2 = vector.load %arg3[%c0_2, %c0_3] : memref<32x96xbf16, #tpu.memory_space<vmem>>, vector<32x96xbf16>
    %cst = arith.constant dense<0.000000e+00> : vector<8x96xf32>
    %3 = tpu.matmul %1, %2, %cst {dimension_numbers = #tpu.dot_dimension_numbers<[1], [0], [0], [1], [0, 0, 1, 1], [], []>} : vector<8x32xbf16>, vector<32x96xbf16>, vector<8x96xf32> -> vector<8x96xf32>
    %c0_4 = arith.constant 0 : index
    %c0_5 = arith.constant 0 : index
    %4 = vector.load %arg4[%c0_4, %c0_5] : memref<1x96xf32, #tpu.memory_space<vmem>>, vector<1x96xf32>
    %5 = vector.broadcast %4 : vector<1x96xf32> to vector<8x96xf32>
    %6 = arith.addf %3, %5 : vector<8x96xf32>
    %7 = vector.extract_strided_slice %6 {offsets = [0, 0], sizes = [8, 32], strides = [1, 1]} : vector<8x96xf32> to vector<8x32xf32>
    %8 = vector.extract_strided_slice %6 {offsets = [0, 32], sizes = [8, 32], strides = [1, 1]} : vector<8x96xf32> to vector<8x32xf32>
    %9 = vector.extract_strided_slice %6 {offsets = [0, 64], sizes = [8, 32], strides = [1, 1]} : vector<8x96xf32> to vector<8x32xf32>
    %c0_6 = arith.constant 0 : index
    %c0_7 = arith.constant 0 : index
    %10 = vector.load %arg5[%c0_6, %c0_7] : memref<8x32xf32, #tpu.memory_space<vmem>>, vector<8x32xf32>
    %c0_8 = arith.constant 0 : index
    %c0_9 = arith.constant 0 : index
    %11 = vector.load %arg6[%c0_8, %c0_9] : memref<8x32xf32, #tpu.memory_space<vmem>>, vector<8x32xf32>
    %12 = arith.mulf %7, %10 : vector<8x32xf32>
    %13 = vector.extract_strided_slice %7 {offsets = [0, 4], sizes = [8, 4], strides = [1, 1]} : vector<8x32xf32> to vector<8x4xf32>
    %14 = vector.extract_strided_slice %7 {offsets = [0, 0], sizes = [8, 4], strides = [1, 1]} : vector<8x32xf32> to vector<8x4xf32>
    %15 = vector.extract_strided_slice %7 {offsets = [0, 12], sizes = [8, 4], strides = [1, 1]} : vector<8x32xf32> to vector<8x4xf32>
    %16 = vector.extract_strided_slice %7 {offsets = [0, 8], sizes = [8, 4], strides = [1, 1]} : vector<8x32xf32> to vector<8x4xf32>
    %17 = vector.extract_strided_slice %7 {offsets = [0, 20], sizes = [8, 4], strides = [1, 1]} : vector<8x32xf32> to vector<8x4xf32>
    %18 = vector.extract_strided_slice %7 {offsets = [0, 16], sizes = [8, 4], strides = [1, 1]} : vector<8x32xf32> to vector<8x4xf32>
    %19 = vector.extract_strided_slice %7 {offsets = [0, 28], sizes = [8, 4], strides = [1, 1]} : vector<8x32xf32> to vector<8x4xf32>
    %20 = vector.extract_strided_slice %7 {offsets = [0, 24], sizes = [8, 4], strides = [1, 1]} : vector<8x32xf32> to vector<8x4xf32>
    %21 = tpu.concatenate %13, %14, %15, %16, %17, %18, %19, %20 in 1 : vector<8x4xf32>, vector<8x4xf32>, vector<8x4xf32>, vector<8x4xf32>, vector<8x4xf32>, vector<8x4xf32>, vector<8x4xf32>, vector<8x4xf32> -> vector<8x32xf32>
    %22 = arith.mulf %21, %11 : vector<8x32xf32>
    %23 = arith.addf %12, %22 : vector<8x32xf32>
    %24 = arith.truncf %23 : vector<8x32xf32> to vector<8x32xbf16>
    %c0_10 = arith.constant 0 : index
    %c0_11 = arith.constant 0 : index
    %c0_12 = arith.constant 0 : index
    %25 = vector.load %arg7[%c0_10, %c0_11, %c0_12] : memref<1x8x32xbf16, #tpu.memory_space<vmem>>, vector<1x8x32xbf16>
    %26 = vector.shape_cast %25 : vector<1x8x32xbf16> to vector<8x32xbf16>
    %27 = vector.shape_cast %24 : vector<8x32xbf16> to vector<1x8x32xbf16>
    tpu.vector_store %arg7[%c0_10, %c0_11, %c0_12], %27 {strides = array<i32>} : memref<1x8x32xbf16, #tpu.memory_space<vmem>>, vector<1x8x32xbf16>,
    %28 = arith.mulf %8, %10 : vector<8x32xf32>
    %29 = vector.extract_strided_slice %8 {offsets = [0, 4], sizes = [8, 4], strides = [1, 1]} : vector<8x32xf32> to vector<8x4xf32>
    %30 = vector.extract_strided_slice %8 {offsets = [0, 0], sizes = [8, 4], strides = [1, 1]} : vector<8x32xf32> to vector<8x4xf32>
    %31 = vector.extract_strided_slice %8 {offsets = [0, 12], sizes = [8, 4], strides = [1, 1]} : vector<8x32xf32> to vector<8x4xf32>
    %32 = vector.extract_strided_slice %8 {offsets = [0, 8], sizes = [8, 4], strides = [1, 1]} : vector<8x32xf32> to vector<8x4xf32>
    %33 = vector.extract_strided_slice %8 {offsets = [0, 20], sizes = [8, 4], strides = [1, 1]} : vector<8x32xf32> to vector<8x4xf32>
    %34 = vector.extract_strided_slice %8 {offsets = [0, 16], sizes = [8, 4], strides = [1, 1]} : vector<8x32xf32> to vector<8x4xf32>
    %35 = vector.extract_strided_slice %8 {offsets = [0, 28], sizes = [8, 4], strides = [1, 1]} : vector<8x32xf32> to vector<8x4xf32>
    %36 = vector.extract_strided_slice %8 {offsets = [0, 24], sizes = [8, 4], strides = [1, 1]} : vector<8x32xf32> to vector<8x4xf32>
    %37 = tpu.concatenate %29, %30, %31, %32, %33, %34, %35, %36 in 1 : vector<8x4xf32>, vector<8x4xf32>, vector<8x4xf32>, vector<8x4xf32>, vector<8x4xf32>, vector<8x4xf32>, vector<8x4xf32>, vector<8x4xf32> -> vector<8x32xf32>
    %38 = arith.mulf %37, %11 : vector<8x32xf32>
    %39 = arith.addf %28, %38 : vector<8x32xf32>
    %40 = arith.truncf %39 : vector<8x32xf32> to vector<8x32xbf16>
    %c0_13 = arith.constant 0 : index
    %c0_14 = arith.constant 0 : index
    %c0_15 = arith.constant 0 : index
    %41 = vector.load %arg8[%c0_13, %c0_14, %c0_15] : memref<1x8x32xbf16, #tpu.memory_space<vmem>>, vector<1x8x32xbf16>
    %42 = vector.shape_cast %41 : vector<1x8x32xbf16> to vector<8x32xbf16>
    %43 = vector.shape_cast %40 : vector<8x32xbf16> to vector<1x8x32xbf16>
    tpu.vector_store %arg8[%c0_13, %c0_14, %c0_15], %43 {strides = array<i32>} : memref<1x8x32xbf16, #tpu.memory_space<vmem>>, vector<1x8x32xbf16>,
    %44 = arith.truncf %9 : vector<8x32xf32> to vector<8x32xbf16>
    %c0_16 = arith.constant 0 : index
    %c0_17 = arith.constant 0 : index
    %c0_18 = arith.constant 0 : index
    %45 = vector.load %arg9[%c0_16, %c0_17, %c0_18] : memref<1x8x32xbf16, #tpu.memory_space<vmem>>, vector<1x8x32xbf16>
    %46 = vector.shape_cast %45 : vector<1x8x32xbf16> to vector<8x32xbf16>
    %47 = vector.shape_cast %44 : vector<8x32xbf16> to vector<1x8x32xbf16>
    tpu.vector_store %arg9[%c0_16, %c0_17, %c0_18], %47 {strides = array<i32>} : memref<1x8x32xbf16, #tpu.memory_space<vmem>>, vector<1x8x32xbf16>,
    return
  }
  func.func @transform_0(%arg0: i32, %arg1: i32) -> (i32, i32, i32) {
    %c0_i32 = arith.constant 0 : i32
    %c0_i32_0 = arith.constant 0 : i32
    return %arg0, %arg1, %c0_i32 : i32, i32, i32
  }
  func.func @transform_1(%arg0: i32, %arg1: i32) -> (i32, i32) {
    %c0_i32 = arith.constant 0 : i32
    %c0_i32_0 = arith.constant 0 : i32
    %c0_i32_1 = arith.constant 0 : i32
    return %c0_i32, %c0_i32_0 : i32, i32
  }
  func.func @transform_2(%arg0: i32, %arg1: i32) -> (i32, i32) {
    %c0_i32 = arith.constant 0 : i32
    %c0_i32_0 = arith.constant 0 : i32
    %c0_i32_1 = arith.constant 0 : i32
    return %c0_i32, %c0_i32_0 : i32, i32
  }
  func.func @transform_3(%arg0: i32, %arg1: i32) -> (i32, i32) {
    %c0_i32 = arith.constant 0 : i32
    %c0_i32_0 = arith.constant 0 : i32
    return %arg1, %c0_i32 : i32, i32
  }
  func.func @transform_4(%arg0: i32, %arg1: i32) -> (i32, i32) {
    %c0_i32 = arith.constant 0 : i32
    %c0_i32_0 = arith.constant 0 : i32
    return %arg1, %c0_i32 : i32, i32
  }
  func.func @transform_5(%arg0: i32, %arg1: i32) -> (i32, i32, i32) {
    %c0_i32 = arith.constant 0 : i32
    %c0_i32_0 = arith.constant 0 : i32
    return %arg0, %arg1, %c0_i32 : i32, i32, i32
  }
  func.func @transform_6(%arg0: i32, %arg1: i32) -> (i32, i32, i32) {
    %c0_i32 = arith.constant 0 : i32
    %c0_i32_0 = arith.constant 0 : i32
    return %arg0, %arg1, %c0_i32 : i32, i32, i32
  }
  func.func @transform_7(%arg0: i32, %arg1: i32) -> (i32, i32, i32) {
    %c0_i32 = arith.constant 0 : i32
    %c0_i32_0 = arith.constant 0 : i32
    return %arg0, %arg1, %c0_i32 : i32, i32, i32
  }
}

</mosaic_0001>

<bundles_post_ra>
// kernel: tpu_custom_call.1
= control target key start
LH: loop header
LB: loop body
LE: loop exit
PB: predicated region body
PF: predicated region fallthrough
CT: control target
= control target key end

     0   :  { %s1456_s0 = inlined_call_operand.hbm [shape: bf16[2,8,32], index: 0, kind: input, shape index: {}]   ;;  %s1457_s1 = inlined_call_operand.hbm [shape: bf16[32,96], index: 1, kind: input, shape index: {}]   ;;  %s1458_s2 = inlined_call_operand.vmem [shape: f32[1,96], index: 2, kind: input, shape index: {}]   ;;  %s1459_s3 = inlined_call_operand.hbm [shape: f32[8,32], index: 3, kind: input, shape index: {}]   ;;  %s1460_s4 = inlined_call_operand.hbm [shape: f32[8,32], index: 4, kind: input, shape index: {}]   ;;  %s1461_s5 = inlined_call_operand.hbm [shape: bf16[2,8,32], index: 5, kind: output, shape index: {0}]   ;;  %s1462_s6 = inlined_call_operand.hbm [shape: bf16[2,8,32], index: 6, kind: output, shape index: {1}]   ;;  %s1463_s7 = inlined_call_operand.hbm [shape: bf16[2,8,32], index: 7, kind: output, shape index: {2}]  }
   0x1   :  { %1465 = sst [smem:[#allocation19_spill]] %s1456_s0 }
   0x2   :  { %1466 = sst [smem:[#allocation20_spill]] %s1457_s1 }
   0x3   :  { %1467 = sst [smem:[#allocation21_spill]] %s1458_s2 }
   0x4   :  { %1468 = sst [smem:[#allocation22_spill]] %s1459_s3 }
   0x5   :  { %13 = vsyncpa [#allocation3], 0 }
   0x6   :  { %15 = vsyncpa [#allocation3 + $0x1], 0 }
   0x7   :  { %16 = vsyncpa [#allocation6], 0 }
   0x8   :  { %17 = vsyncpa [#allocation9], 0 }
   0x9   :  { %18 = vsyncpa [#allocation4], 0 }
   0xa   :  { %20 = vsyncpa [#allocation4 + $0x1], 0 }
   0xb   :  { %21 = vsyncpa [#allocation12], 0 }
   0xc   :  { %23 = vsyncpa [#allocation12 + $0x1], 0  ;;  %s1207_s24 = smov 0   ;;  %s1209_s25 = smov 0  }
   0xd   :  { %s1211_s26 = smov 0   ;;  %s1213_s27 = smov 0  }
   0xe   :  { %s1215_s28 = smov 0   ;;  %s1217_s29 = smov 0  }
   0xf LB: > { %s1238_s30 = sadd.s32 4294967295, %s1153_s29   ;;  %p736_p0 = scmp.ge.s32.totalorder %s1153_s29, 1  ;;  %s1153_s29 = sphi %s1217_s29, %s29_s29   ;;  %s1149_s28 = sphi %s1215_s28, %s1484_s28   ;;  %s1145_s27 = sphi %s1213_s27, %s1483_s27   ;;  %s1141_s26 = sphi %s1211_s26, %s1482_s26   ;;  %s1137_s25 = sphi %s1209_s25, %s1481_s25   ;;  %s1133_s24 = sphi %s1207_s24, %s1480_s24  }
  0x10   : > { %p64_p1 = scmp.eq.s32.totalorder %s1238_s30, 0  ;;  %p252_p2 = scmp.lt.s32.totalorder %s1153_s29, 3 }
  0x11   : > { %s1469_s1 = sld [smem:[#allocation20_spill]]  ;;  %s1155_s12 = smov [#allocation5]  }
  0x12   : > { %p1246_p3 = pnand %p736_p0, %p252_p2  ;;  %s265_s13 = sshll.u32 %s1155_s12, 4  ;;  %s266_s13 = int_to_ptr.vmem [resolvable:$true] %s265_s13 }
  0x13   : > { %p740_p6 = scmp.ge.s32.totalorder %s1153_s29, 2  ;;  %s1472_s3 = sld [smem:[#allocation22_spill]] }
  0x14   : > { %p790_p4 = pneg %p1246_p3  ;;  %s1156_s18 = smov 64  }
  0x15   : > { %s1157_s19 = smov 4   ;;  %s1158_s20 = smov [#allocation7]  }
  0x16   : > { %p1254_p5 = pnand %p790_p4, %p64_p1  ;;  %s285_s21 = sshll.u32 %s1158_s20, 4  ;;  %s286_s21 = int_to_ptr.vmem [resolvable:$true] %s285_s21 }
  0x17   : > { %s263_s10 = sshll.u32 %s1469_s1, 4  ;;  %s297_s8 = sshll.u32 %s1460_s4, 4  ;;  %s264_s10 = int_to_ptr.hbm [resolvable:$true] %s263_s10  ;;  %s298_s8 = int_to_ptr.hbm [resolvable:$true] %s297_s8 }
  0x18   : > { %793 = dma.hbm_to_vmem [thread:$0]  (!%p1254_p5), %s264_s10, 256, %s266_s13, [#allocation6], %s1156_s18, %s1156_s18, %s1157_s19  }
  0x19   : > { %s283_s17 = sshll.u32 %s1472_s3, 4  ;;  %s1159_s9 = smov [#allocation8]   ;;  %s284_s17 = int_to_ptr.hbm [resolvable:$true] %s283_s17 }
  0x1a   : > { %796 = dma.hbm_to_vmem [thread:$0]  (!%p1254_p5), %s284_s17, 128, %s286_s21, [#allocation6]  }
  0x1b   : > { %s299_s12 = sshll.u32 %s1159_s9, 4  ;;  %s1464_s10 = sadd.s32 4294967294, %s1153_s29   ;;  %s300_s12 = int_to_ptr.vmem [resolvable:$true] %s299_s12 }
  0x1c   : > { %799 = dma.hbm_to_vmem [thread:$0]  (!%p1254_p5), %s298_s8, 128, %s300_s12, [#allocation9]  }
  0x1d   : > { %s41_s13 = sadd.s32 1, %s1149_s28  ;;  %s50_s15 = sadd.s32 1, %s1141_s26 }
  0x1e   : > { %p43_p7 = scmp.ge.s32.totalorder %s41_s13, 2  ;;  %p57_p8 = scmp.ne.s32.totalorder %s1141_s26, %s1137_s25 }
  0x1f   : > { %p58_p9 = scmp.eq.s32.totalorder %s1153_s29, 0  ;;  %p63_p10 = scmp.ne.s32.totalorder %s1137_s25, %s1133_s24 }
  0x20   : > { %s1486_s13 = smov (%p43_p7, %s41_s13), 0  ;;  %p183_p13 = scmp.eq.s32.totalorder %s1238_s30, 1 }
  0x21   : > { %p1281_p11 = por %p58_p9, %p57_p8  ;;  %p1287_p12 = por %p64_p1, %p63_p10 }
  0x22   : > { %s45_s17 = ssub.s32 %s1149_s28, %s1486_s13  ;;  %p189_p2 = scmp.eq.s32.totalorder %s1464_s10, 1 }
  0x23   : > { %p48_p0 = scmp.eq.s32.totalorder %s45_s17, 0  ;;  %p1296_p4 = por %p183_p13, %p57_p8 }
  0x24   : > { %p817_p5 = scmp.lt.s32.totalorder %s1153_s29, 2  ;;  %p1304_p7 = por %p189_p2, %p63_p10 }
  0x25   : > { %s1302_s19 = scalar_select %p48_p0, %s1141_s26, %s50_s15  }
  0x26   : > { %s310_s21 = sand.u32 1, %s1141_s26   ;;  %s742_s23 = sshll.u32 %s1149_s28, 2 }
  0x27   : > { %s741_s22 = sshll.u32 %s310_s21, 2  ;;  %s1477_s0 = sld [smem:[#allocation19_spill]] }
  0x28   : > { %s314_s17 = scalar_lea.vmem [#allocation2], %s741_s22  ;;  %p801_p8 = pnand %p817_p5, %p1281_p11 }
  0x29   : > { %s323_s10 = sshll.u32 %s314_s17, 4  ;;  %s311_s15 = scalar_lea.sflag [#allocation3], %s310_s21  ;;  %s324_s10 = int_to_ptr.vmem [resolvable:$true] %s323_s10 }
  0x2a   : > { %s1318_s3 = sand.u32 (!%p1246_p3), 1, %s1137_s25  }
  0x2b   : > { %332 = sbr.rel (%p1246_p3) target bundleno = 570 (0x23a), region = 40  ;;  %s1321_s8 = sshll.u32 (!%p1246_p3), %s1318_s3, 2 }
  0x2c   : > { %s335_s22 = scalar_lea.sflag (!%p1246_p3), [#allocation3], %s1318_s3 }
  0x2d   : > { %s319_s12 = scalar_lea.hbm %s1477_s0, %s742_s23  ;;  %s338_s23 = scalar_lea.vmem (!%p1246_p3), [#allocation2], %s1321_s8 }
  0x2e   : > { %s321_s1 = sshll.u32 %s319_s12, 4  ;;  %s322_s1 = int_to_ptr.hbm [resolvable:$true] %s321_s1 }
  0x2f   : > { %803 = dma.hbm_to_vmem [thread:$0]  (!%p801_p8), %s322_s1, 64, %s324_s10, %s311_s15  }
  0x30   : > { %1112 = dma.done.wait (%p1287_p12), %s335_s22, 64  }
  0x31   : > { %1114 = vsyncadd (%p1287_p12), %s335_s22, 4294967232 }
  0x32   : > { %1116 = dma.done.wait (%p64_p1), [#allocation6], 384  }
  0x33   : > { %1118 = vsyncadd (%p64_p1), [#allocation6], 4294966912 }
  0x34   : > { %1120 = dma.done.wait (%p64_p1), [#allocation9], 128  }
  0x35   : > { %1122 = vsyncadd (%p64_p1), [#allocation9], 4294967168  ;;  %v769_v0 = vld [vmem:[#allocation5 + $0x8] sm:$0xff]  ;;  %v434_v1 = vld [vmem:[#allocation7] sm:$0xff]  ;;  %s1160_s1 = smov 32   ;;  %vm417_vm0 = vcmask 261120  }
  0x36   : > { %427 = vmatpush.bf16.msra.mxu0 %v769_v0  ;;  %v768_v2 = vld [vmem:[#allocation5] sm:$0xff]  ;;  %464 = vrot.lane.b32.xlu1 %v434_v1, %s1160_s1  ;;  %v396_v3 = vld [vmem:[%s338_s23] sm:$0xf]  ;;  %s1478_s2 = sld [smem:[#allocation21_spill]]  ;;  %s1161_s16 = smov 124   ;;  %vm444_vm1 = vcmask 31744  }
  0x37   : > { %s1162_s14 = smov 92   ;;  %s1163_s21 = smov 4   ;;  %vm446_vm2 = vcmask 64512   ;;  %vm448_vm3 = vcmask 97280   ;;  %vm450_vm4 = vcmask 130048   ;;  %vm452_vm5 = vcmask 162816  }
  0x38   : > { %s1164_s9 = smov 100   ;;  %vm454_vm6 = vcmask 195584   ;;  %vm456_vm7 = vcmask 228352   ;;  %v435_v14 = vld [vmem:[#allocation8] sm:$0xff]  ;;  %vm461_vm8 = vcmask 257024   ;;  %s380_s12 = scalar_lea.vmem [#allocation10], %s1321_s8 }
  0x39   : > { %s1165_s17 = smov 64   ;;  %s1368_s15 = sshll.u32 %s1145_s27, 2 }
  0x3a   : > { %428 = vmatpush.bf16.msra.mxu0 %v768_v2  ;;  %s521_s11 = scalar_lea.hbm %s1461_s5, %s1368_s15  ;;  %s523_s10 = sshll.u32 %s380_s12, 4  ;;  %s524_s10 = int_to_ptr.vmem [resolvable:$true] %s523_s10 }
  0x3c   : > { %v882_v4 = vld [vmem:[%s1478_s2] ss:$0 sm:$0xff] }
  0x3d   : > { %759 = vmatmul.msk.bf16.vlgmr.msra.gmra.mxu0 %vm417_vm0, %v396_v3 }
  0xa8   : > { %v465_v33 = vpop.permute.xlu1 %464 }
  0xba   : > { %v430_v5 = vpop.f32.mrf.mxu0 }
  0xbb   : > { %v1341_v6 = vadd.f32 %v882_v4, %v430_v5 }
  0xbd   : > { %438 = vrot.lane.b32.xlu2 %v1341_v6, %s1161_s16  ;;  %468 = vrot.lane.b32.xlu0 %v1341_v6, %s1162_s14  ;;  %v436_v18 = vmul.f32 %v434_v1, %v1341_v6  ;;  %v493_v32 = vpack.c.bf16 %v1341_v6, %v1341_v6  ;;  %s525_s16 = sshll.u32 %s521_s11, 4  ;;  %s500_s14 = scalar_lea.sflag [#allocation4], %s1318_s3  ;;  %s526_s16 = int_to_ptr.hbm [resolvable:$true] %s525_s16 }
  0xc2   : > { %v432_v7 = vpop.f32.mrf.mxu0 }
  0xc5   : > { %441 = vrot.lane.b32.xlu2 %v1341_v6, %s1163_s21  ;;  %471 = vrot.lane.b32.xlu0 %v1341_v6, %s1164_s9 }
 0x117   : > { %v439_v8 = vpop.permute.xlu2 %438 }
 0x11f   : > { %v442_v9 = vpop.permute.xlu2 %441 }
 0x120   : > { %v445_v10 = vsel %vm444_vm1, %v439_v8, %v442_v9 }
 0x121   : > { %v447_v11 = vsel %vm446_vm2, %v445_v10, %v439_v8 }
 0x122   : > { %v449_v12 = vsel %vm448_vm3, %v447_v11, %v442_v9 }
 0x123   : > { %v451_v13 = vsel %vm450_vm4, %v449_v12, %v439_v8 }
 0x124   : > { %v453_v15 = vsel %vm452_vm5, %v451_v13, %v442_v9 }
 0x125   : > { %v455_v16 = vsel %vm454_vm6, %v453_v15, %v439_v8 }
 0x126   : > { %v457_v17 = vsel %vm456_vm7, %v455_v16, %v442_v9 }
 0x127   : > { %v458_v19 = vmul.f32 %v457_v17, %v435_v14 }
 0x129   : > { %v459_v20 = vadd.f32 %v458_v19, %v436_v18 }
 0x12b   : > { %v460_v21 = vpack.c.bf16 %v459_v20, %v459_v20 }
 0x12d   : > { %462 = vst.msk [vmem:[%s380_s12] sm:$0xf] %vm461_vm8, %v460_v21 }
 0x12f   : > { %v469_v22 = vpop.permute.xlu0 %468 }
 0x137   : > { %v472_v23 = vpop.permute.xlu0 %471 }
 0x138   : > { %v474_v24 = vsel %vm444_vm1, %v469_v22, %v472_v23 }
 0x139   : > { %v475_v25 = vsel %vm446_vm2, %v474_v24, %v469_v22 }
 0x13a   : > { %v476_v26 = vsel %vm448_vm3, %v475_v25, %v472_v23 }
 0x13b   : > { %v477_v27 = vsel %vm450_vm4, %v476_v26, %v469_v22 }
 0x13c   : > { %v478_v28 = vsel %vm452_vm5, %v477_v27, %v472_v23 }
 0x13d   : > { %v479_v29 = vsel %vm454_vm6, %v478_v28, %v469_v22 }
 0x13e   : > { %v480_v30 = vsel %vm456_vm7, %v479_v29, %v472_v23 }
 0x13f   : > { %v481_v31 = vmul.f32 %v480_v30, %v435_v14 }
 0x141   : > { %483 = vrot.lane.b32.xlu1 %v481_v31, %s1160_s1  ;;  %s1017_s1 = sshra.s32 %s526_s16, 4  ;;  %s1018_s1 = int_to_ptr.hbm [resolvable:$true] %s1017_s1 }
 0x142   : > { %s1019_s21 = scalar_lea.hbm %s1018_s1, 4  ;;  %p1024_p10 = scmp.lt.s32.totalorder %s1018_s1, %s1461_s5 }
 0x143   : > { %p1020_p1 = scmp.ne.s32.totalorder %s1018_s1, %s1019_s21 }
 0x145   : > { %p1021_p3 = pnand %p1020_p1, %p1296_p4 }
 0x147   : > { %p1022_p9 = pneg %p1021_p3 }
 0x149   : > { %495 = vrot.lane.b32.xlu1 %v493_v32, %s1165_s17  ;;  %s1023_s17 = scalar_lea.hbm %s1461_s5, 8 }
 0x14a   : > { %p1025_p11 = scmp.lt.s32.totalorder %s1023_s17, %s1019_s21 }
 0x14c   : > { %p1026_p12 = por %p1025_p11, %p1024_p10 }
 0x14e   : > { %p1027_p13 = pnand %p1026_p12, %p1022_p9 }
 0x150   : > { %1030 = shalt.err (!%p1027_p13)
}
 0x151   : > { %784 = dma.vmem_to_hbm [thread:$0]  (%p1296_p4), %s524_s10, 64, %s526_s16, %s500_s14   ;;  %v467_v34 = vmul.f32 %v465_v33, %v1341_v6 }
 0x152   : > { %s1166_s3 = smov 96   ;;  %s394_s0 = scalar_lea.vmem [#allocation13], %s1321_s8 }
 0x153   : > { %s536_s22 = scalar_lea.hbm %s1462_s6, %s1368_s15  ;;  %s551_s1 = scalar_lea.hbm %s1463_s7, %s1368_s15 }
 0x154   : > { %s504_s10 = sand.u32 1, %s1238_s30   ;;  %s387_s16 = scalar_lea.vmem [#allocation11], %s1321_s8 }
 0x155   : > { %s538_s14 = sshll.u32 %s387_s16, 4  ;;  %s540_s21 = sshll.u32 %s536_s22, 4  ;;  %s539_s14 = int_to_ptr.vmem [resolvable:$true] %s538_s14  ;;  %s541_s21 = int_to_ptr.hbm [resolvable:$true] %s540_s21 }
 0x156   : > { %s1398_s27 = sshll.u32 %s394_s0, 4  ;;  %s1400_s9 = sshll.u32 %s551_s1, 4  ;;  %s554_s27 = int_to_ptr.vmem [resolvable:$true] %s1398_s27  ;;  %s556_s9 = int_to_ptr.hbm [resolvable:$true] %s1400_s9 }
 0x157   : > { %s505_s17 = scalar_lea.sflag [#allocation12], %s504_s10  ;;  %s1045_s15 = sshra.s32 %s541_s21, 4  ;;  %s1046_s15 = int_to_ptr.hbm [resolvable:$true] %s1045_s15 }
 0x158   : > { %s1047_s30 = scalar_lea.hbm %s1046_s15, 4  ;;  %p1052_p8 = scmp.lt.s32.totalorder %s1046_s15, %s1462_s6 }
 0x159   : > { %p1048_p0 = scmp.ne.s32.totalorder %s1046_s15, %s1047_s30 }
 0x15b   : > { %p1049_p2 = pnand %p1048_p0, %p1296_p4 }
 0x15d   : > { %p1050_p5 = pneg %p1049_p2 }
 0x1b3   : > { %v484_v35 = vpop.permute.xlu1 %483 }
 0x1b4   : > { %v486_v36 = vadd.f32 %v484_v35, %v467_v34 }
 0x1b6   : > { %v487_v37 = vpack.c.bf16 %v486_v36, %v486_v36 }
 0x1b8   : > { %489 = vrot.lane.b32.xlu0 %v487_v37, %s1166_s3 }
 0x1bb   : > { %v496_v38 = vpop.permute.xlu1 %495 }
 0x1bc   : > { %498 = vst.msk [vmem:[%s394_s0] sm:$0xf] %vm461_vm8, %v496_v38  ;;  %s1051_s0 = scalar_lea.hbm %s1462_s6, 8 }
 0x1bd   : > { %p1053_p1 = scmp.lt.s32.totalorder %s1051_s0, %s1047_s30 }
 0x1bf   : > { %p1054_p3 = por %p1053_p1, %p1052_p8 }
 0x1c1   : > { %p1055_p9 = pnand %p1054_p3, %p1050_p5 }
 0x22a   : > { %v490_v39 = vpop.permute.xlu0 %489 }
 0x22b   : > { %492 = vst.msk [vmem:[%s387_s16] sm:$0xf] %vm461_vm8, %v490_v39 }
 0x22c   : > { %1058 = shalt.err (!%p1055_p9)
}
 0x22d   : > { %785 = dma.vmem_to_hbm [thread:$0]  (%p1296_p4), %s539_s14, 64, %s541_s21, %s505_s17  }
 0x22e   : > { %s1073_s22 = sshra.s32 %s556_s9, 4  ;;  %s1079_s10 = scalar_lea.hbm %s1463_s7, 8  ;;  %s1074_s22 = int_to_ptr.hbm [resolvable:$true] %s1073_s22 }
 0x22f   : > { %s1075_s23 = scalar_lea.hbm %s1074_s22, 4  ;;  %p1080_p13 = scmp.lt.s32.totalorder %s1074_s22, %s1463_s7 }
 0x230   : > { %p1076_p10 = scmp.ne.s32.totalorder %s1074_s22, %s1075_s23  ;;  %p1081_p0 = scmp.lt.s32.totalorder %s1079_s10, %s1075_s23 }
 0x232   : > { %p1077_p11 = pnand %p1076_p10, %p1296_p4  ;;  %p1082_p2 = por %p1081_p0, %p1080_p13 }
 0x234   : > { %p1078_p12 = pneg %p1077_p11 }
 0x236   : > { %p1083_p5 = pnand %p1082_p2, %p1078_p12 }
 0x238   : > { %1086 = shalt.err (!%p1083_p5)
}
 0x239   : > { %786 = dma.vmem_to_hbm [thread:$0]  (%p1296_p4), %s554_s27, 64, %s556_s9, %s505_s17  }
 0x23a PF: > { %s567_s14 = sand.u32 1, %s1133_s24   ;;  %p805_p8 = pnand %p740_p6, %p1304_p7 }
 0x23b   : > { %s568_s21 = scalar_lea.sflag [#allocation4], %s567_s14 }
 0x23c   : > { %p806_p1 = pneg %p805_p8 }
 0x23e   : > { %1124 = dma.done.wait (%p806_p1), %s568_s21, 64  }
 0x23f   : > { %1126 = vsyncadd (%p806_p1), %s568_s21, 4294967232  ;;  %s1479_s30 = sadd.s32 4294967294, %s1153_s29  }
 0x240   : > { %s577_s18 = sand.u32 1, %s1479_s30  }
 0x241   : > { %s578_s8 = scalar_lea.sflag [#allocation12], %s577_s18 }
 0x242   : > { %1128 = dma.done.wait (%p806_p1), %s578_s8, 128  }
 0x243   : > { %1130 = vsyncadd (%p806_p1), %s578_s8, 4294967168  ;;  %s29_s29 = sadd.s32 1, %s1153_s29   ;;  %s1480_s24 = smov %s1137_s25 }
 0x244   : > { %p26_p4 = scmp.ge.s32.totalorder %s29_s29, 4   ;;  %s1481_s25 = smov %s1141_s26 }
 0x245   : > { %s1482_s26 = smov %s1302_s19  ;;  %s1483_s27 = smov %s1149_s28 }
 0x246   : > { %s1484_s28 = smov %s1486_s13  ;;  %28 = sbr.rel (!%p26_p4) target bundleno = 15 (0xf), region = 131 }
 0x24b   :  { %594 = vsyncpa [#allocation3], 1 }
 0x24c   :  { %596 = vsyncpa [#allocation3 + $0x1], 1 }
 0x24d   :  { %597 = vsyncpa [#allocation6], 1 }
 0x24e   :  { %598 = vsyncpa [#allocation9], 1 }
 0x24f   :  { %599 = vsyncpa [#allocation4], 1 }
 0x250   :  { %601 = vsyncpa [#allocation4 + $0x1], 1 }
 0x251   :  { %602 = vsyncpa [#allocation12], 1 }
 0x252   :  { %604 = vsyncpa [#allocation12 + $0x1], 1 }

</bundles_post_ra>
